<compile_context>
chip_gen: v6e
topology: v6e:2x2x1
jax: 0.10.0
libtpu: 0.0.40
codegen_flags: <defaults>
</compile_context>

<pallas_src>
import jax
import jax.numpy as jnp
from jax.experimental import pallas as pl
from jax.experimental.pallas import tpu as pltpu

_LANE = 1024                              # lane-dense width (multiple of 128)
_TARGET_BLOCK_BYTES = 4 * 1024 * 1024     # ~4 MiB tile, byte-constant across dtypes
_VMEM_LIMIT_BYTES = 32 * 1024 * 1024      # 2 in + 2 out double-buffered 4 MiB tiles = 16 MiB
_SMALL_N_BYTES = 256 * 1024               # below this, plain XLA where wins


def _round_up(v, m):
    return ((v + m - 1) // m) * m


def _naive_sampler_kernel(x_ref, y_ref):
    x = x_ref[...]
    # Scalar (0-d) constants: no full-tile broadcast materialization.
    one = jnp.asarray(1, dtype=x.dtype)
    y_ref[...] = jnp.where(x >= 0, one, -one)


def _where_ref(x):
    one = jnp.asarray(1, dtype=x.dtype)
    return jnp.where(x >= 0, one, -one)


def naive_sampler(x):
    """y = where(x >= 0, 1, -1) elementwise, via a tiled/pipelined Pallas kernel.

    Accepts any shape (e.g. NCHW) and dtype; shape/dtype are preserved.
    All layout plumbing is free reshapes (no pad, no slice); the elementwise
    select runs on the VPU inside the kernel.
    """
    orig_shape = x.shape
    dtype = x.dtype
    n = int(x.size)
    if n == 0:
        return x

    itemsize = jnp.dtype(dtype).itemsize

    # Fast path: tiny tensors — pallas_call dispatch + one pipeline step costs
    # more than the single fused XLA select.
    if n * itemsize < _SMALL_N_BYTES:
        return _where_ref(x)

    # Sublane granule depends on element width (f32:8, bf16:16, int8:32).
    sub = {4: 8, 2: 16, 1: 32}.get(itemsize, 8)

    compiler_params = pltpu.CompilerParams(
        # Independent tiles -> shard across TensorCores on v7x.
        dimension_semantics=("parallel",),
        vmem_limit_bytes=_VMEM_LIMIT_BYTES,
    )

    if n % _LANE == 0:
        # --- 2-D lane-dense path: (rows, 1024), tile the row axis -----------
        rows = n // _LANE
        target_rows = max(sub, _TARGET_BLOCK_BYTES // (_LANE * itemsize))
        if rows >= 2 * target_rows:
            block_rows = target_rows
        else:
            # Mid-sized input: split into (at least) 2 blocks so both v7x
            # TensorCores get work.
            block_rows = max(sub, _round_up(pl.cdiv(rows, 2), sub))
        grid = (pl.cdiv(rows, block_rows),)   # ragged last block -> masked writes

        x2d = x.reshape(rows, _LANE)
        y2d = pl.pallas_call(
            _naive_sampler_kernel,
            out_shape=jax.ShapeDtypeStruct((rows, _LANE), dtype),
            grid_spec=pl.GridSpec(
                grid=grid,
                in_specs=[pl.BlockSpec((block_rows, _LANE), lambda i: (i, 0))],
                out_specs=pl.BlockSpec((block_rows, _LANE), lambda i: (i, 0)),
            ),
            compiler_params=compiler_params,
        )(x2d)
        return y2d.reshape(orig_shape)

    # --- 1-D flat path for arbitrary n (no padding at all) ------------------
    granule = sub * 128                       # 1024 / 2048 / 4096 elements
    target_elems = max(granule, _TARGET_BLOCK_BYTES // itemsize)
    if n >= 2 * target_elems:
        block_elems = target_elems
    else:
        block_elems = max(granule, _round_up(pl.cdiv(n, 2), granule))
    grid = (pl.cdiv(n, block_elems),)         # ragged last block -> masked writes

    x1d = x.reshape(-1)
    y1d = pl.pallas_call(
        _naive_sampler_kernel,
        out_shape=jax.ShapeDtypeStruct((n,), dtype),
        grid_spec=pl.GridSpec(
            grid=grid,
            in_specs=[pl.BlockSpec((block_elems,), lambda i: (i,))],
            out_specs=pl.BlockSpec((block_elems,), lambda i: (i,)),
        ),
        compiler_params=compiler_params,
    )(x1d)
    return y1d.reshape(orig_shape)


if __name__ == "__main__":
    key = jax.random.PRNGKey(0)
    k0, k1, k2, k3 = jax.random.split(key, 4)

    def _check(x):
        y = jax.block_until_ready(naive_sampler(x))
        ref = jnp.where(x >= 0, jnp.ones_like(x), -jnp.ones_like(x))
        assert y.shape == x.shape and y.dtype == x.dtype
        assert bool(jnp.all(y == ref))

    # Small NCHW input consistent with the module's typical usage (fast path).
    _check(jax.random.normal(k0, (2, 4, 16, 16), dtype=jnp.float32))

    # Non-divisible small shape (fast path, covers odd sizes).
    _check(jax.random.normal(k1, (3, 5, 17, 19), dtype=jnp.float32))

    # Lane-aligned shape -> 2-D Pallas path (grid of 2, ragged-free).
    _check(jax.random.normal(k2, (2, 4, 128, 256), dtype=jnp.float32))

    # Arbitrary (non multiple-of-1024) size -> 1-D Pallas path with a ragged
    # last block handled by Pallas' masked writes (no pad / slice).
    _check(jax.random.normal(k3, (3, 5, 67, 231), dtype=jnp.float32))

    # bf16 input -> byte-constant tile scaling path.
    _check(jax.random.normal(k2, (2, 4, 256, 256), dtype=jnp.bfloat16))

    print("KERNEL_OK")
</pallas_src>

<mosaic_0001>
module attributes {stable_mosaic.version = 11 : i64} {
  func.func @_naive_sampler_kernel(%arg0: i32, %arg1: memref<128x1024xf32, #tpu.memory_space<vmem>>, %arg2: memref<128x1024xf32, #tpu.memory_space<vmem>>) attributes {dimension_semantics = [#tpu.dimension_semantics<parallel>], iteration_bounds = array<i64: 2>, scalar_prefetch = 0 : i64, scratch_operands = 0 : i64, tpu.core_type = #tpu.core_type<tc>, window_params = [{transform_indices = @transform_0, window_bounds = array<i64: 128, 1024>}, {transform_indices = @transform_1, window_bounds = array<i64: 128, 1024>}]} {
    %c0 = arith.constant 0 : index
    %c0_0 = arith.constant 0 : index
    %0 = vector.load %arg1[%c0, %c0_0] : memref<128x1024xf32, #tpu.memory_space<vmem>>, vector<128x1024xf32>
    %cst = arith.constant 0.000000e+00 : f32
    %1 = vector.broadcast %cst : f32 to vector<128x1024xf32>
    %2 = arith.cmpf oge, %0, %1 : vector<128x1024xf32>
    %cst_1 = arith.constant 0.000000e+00 : f32
    %cst_2 = arith.constant 1.000000e+00 : f32
    %3 = arith.subf %cst_1, %cst_2 : f32
    %cst_3 = arith.constant 1.000000e+00 : f32
    %4 = vector.broadcast %cst_3 : f32 to vector<128x1024xf32>
    %5 = vector.broadcast %3 : f32 to vector<128x1024xf32>
    %6 = arith.select %2, %4, %5 : vector<128x1024xi1>, vector<128x1024xf32>
    %c0_4 = arith.constant 0 : index
    %c0_5 = arith.constant 0 : index
    %7 = vector.load %arg2[%c0_4, %c0_5] : memref<128x1024xf32, #tpu.memory_space<vmem>>, vector<128x1024xf32>
    tpu.vector_store %arg2[%c0_4, %c0_5], %6 {strides = array<i32>} : memref<128x1024xf32, #tpu.memory_space<vmem>>, vector<128x1024xf32>,
    return
  }
  func.func @transform_0(%arg0: i32) -> (i32, i32) {
    %c0_i32 = arith.constant 0 : i32
    %c0_i32_0 = arith.constant 0 : i32
    return %arg0, %c0_i32 : i32, i32
  }
  func.func @transform_1(%arg0: i32) -> (i32, i32) {
    %c0_i32 = arith.constant 0 : i32
    %c0_i32_0 = arith.constant 0 : i32
    return %arg0, %c0_i32 : i32, i32
  }
}

</mosaic_0001>

<bundles_post_ra>
// kernel: tpu_custom_call.1
= control target key start
LH: loop header
LB: loop body
LE: loop exit
PB: predicated region body
PF: predicated region fallthrough
CT: control target
= control target key end

     0   :  { %6 = vsyncpa [#allocation3], 0  ;;  %s1467_s0 = inlined_call_operand.hbm [shape: f32[256,1024], index: 0, kind: input, shape index: {}]   ;;  %s1468_s1 = inlined_call_operand.hbm [shape: f32[256,1024], index: 1, kind: output, shape index: {}]  }
   0x1   :  { %8 = vsyncpa [#allocation3 + $0x1], 0 }
   0x2   :  { %9 = vsyncpa [#allocation4], 0 }
   0x3   :  { %11 = vsyncpa [#allocation4 + $0x1], 0  ;;  %s920_s6 = smov 0   ;;  %s922_s7 = smov 0  }
   0x4   :  { %s924_s8 = smov 0   ;;  %s926_s9 = smov 0  }
   0x5 LB: > { %s941_s10 = sadd.s32 4294967295, %s901_s9   ;;  %s738_s11 = sadd.s32 4294967294, %s901_s9   ;;  %s901_s9 = sphi %s926_s9, %s1483_s9   ;;  %s897_s8 = sphi %s924_s8, %s1482_s8   ;;  %s893_s7 = sphi %s922_s7, %s1481_s7   ;;  %s889_s6 = sphi %s920_s6, %s1480_s6  }
   0x6   : > { %s945_s12 = sadd.s32 1, %s901_s9   ;;  %s24_s13 = sadd.s32 1, %s897_s8 }
   0x7   : > { %s21_s14 = ssub.s32 %s901_s9, %s945_s12  ;;  %p31_p0 = scmp.ne.s32.totalorder %s897_s8, %s893_s7 }
   0x8   : > { %p22_p1 = scmp.eq.s32.totalorder %s21_s14, 0  ;;  %p32_p2 = scmp.eq.s32.totalorder %s901_s9, 0 }
   0x9   : > { %p37_p3 = scmp.ne.s32.totalorder %s893_s7, %s889_s6  ;;  %p38_p4 = scmp.eq.s32.totalorder %s941_s10, 0 }
   0xa   : > { %s957_s15 = scalar_select %p22_p1, %s897_s8, %s24_s13  }
   0xb   : > { %p959_p5 = por %p32_p2, %p31_p0  ;;  %p963_p6 = por %p38_p4, %p37_p3 }
   0xc   : > { %p61_p7 = scmp.eq.s32.totalorder %s941_s10, 1  ;;  %p67_p8 = scmp.eq.s32.totalorder %s738_s11, 1 }
   0xd   : > { %s1472_s17 = scalar_select %p963_p6, 1, 0 }
   0xe   : > { %p770_p10 = scmp.lt.s32.totalorder %s901_s9, 2  ;;  %p970_p11 = por %p61_p7, %p31_p0 }
   0xf   : > { %p974_p12 = por %p67_p8, %p37_p3  ;;  %s87_s20 = sand.u32 1, %s897_s8  }
  0x10   : > { %s1473_s18 = scalar_select %p970_p11, 1, 0 }
  0x11   : > { %s1474_s19 = scalar_select %p974_p12, 1, 0 }
  0x12   : > { %s755_s21 = sshll.u32 %s901_s9, 14  ;;  %s741_s22 = sshll.u32 %s87_s20, 10 }
  0x13   : > { %s983_s25 = scalar_lea.hbm %s1467_s0, %s755_s21  ;;  %s91_s26 = scalar_lea.vmem [#allocation2], %s741_s22 }
  0x14   : > { %s99_s27 = sshll.u32 %s91_s26, 4  ;;  %p987_p13 = pnand %p770_p10, %p959_p5  ;;  %s991_s27 = int_to_ptr.vmem [resolvable:$true] %s99_s27 }
  0x15   : > { %s993_s29 = scalar_lea.sflag [#allocation3], %s87_s20  ;;  %s809_s30 = scalar_lea.hbm %s983_s25, 16384 }
  0x16   : > { %p810_p0 = scmp.ne.s32.totalorder %s983_s25, %s809_s30  ;;  %p811_p1 = pneg %p987_p13 }
  0x17   : > { %s814_s4 = scalar_lea.hbm %s1467_s0, 32768  ;;  %p815_p4 = scmp.lt.s32.totalorder %s983_s25, %s1467_s0 }
  0x18   : > { %p812_p2 = pnand %p811_p1, %p810_p0  ;;  %p816_p5 = scmp.lt.s32.totalorder %s814_s4, %s809_s30 }
  0x1a   : > { %p813_p3 = pneg %p812_p2  ;;  %p817_p7 = por %p816_p5, %p815_p4 }
  0x1c   : > { %p818_p8 = pnand %p817_p7, %p813_p3 }
  0x1e   : > { %821 = shalt.err (!%p818_p8)
}
  0x1f   : > { %s822_s13 = scalar_lea.vmem %s991_s27, 16384  ;;  %s903_s14 = smov [#allocation2]  }
  0x20   : > { %p823_p10 = scmp.ne.s32.totalorder %s991_s27, %s822_s13  ;;  %s827_s16 = sshll.u32 %s903_s14, 4  ;;  %s828_s16 = int_to_ptr.vmem [resolvable:$false] %s827_s16 }
  0x21   : > { %s829_s20 = scalar_lea.vmem %s828_s16, 32768  ;;  %p830_p2 = scmp.lt.s32.totalorder %s991_s27, %s828_s16 }
  0x22   : > { %p825_p9 = pnand %p823_p10, %p811_p1  ;;  %p831_p12 = scmp.lt.s32.totalorder %s829_s20, %s822_s13 }
  0x24   : > { %p826_p0 = pneg %p825_p9  ;;  %p832_p11 = por %p831_p12, %p830_p2 }
  0x26   : > { %p833_p6 = pnand %p832_p11, %p826_p0 }
  0x28   : > { %836 = shalt.err (!%p833_p6)
}
  0x29   : > { %s904_s21 = smov 1024   ;;  %s905_s22 = smov 64  }
  0x2a   : > { %765 = dma.hbm_to_vmem [thread:$0]  (!%p987_p13), %s983_s25, 16384, %s991_s27, %s993_s29, %s904_s21, %s904_s21, %s905_s22  }
  0x2b   : > { %p745_p9 = scmp.ge.s32.totalorder %s901_s9, 1  ;;  %p107_p1 = scmp.lt.s32.totalorder %s901_s9, 3 }
  0x2d   : > { %p108_p3 = pnand %p745_p9, %p107_p1 }
  0x2e   : > { %s1017_s23 = sand.u32 (!%p108_p3), 1, %s893_s7   ;;  %p1476_p6 = scmp.ne.s32.totalorder (!%p108_p3), %s1472_s17, 0 }
  0x2f   : > { %111 = sbr.rel (%p108_p3) target bundleno = 162 (0xa2), region = 24  ;;  %s746_s24 = sshll.u32 (!%p108_p3), %s1017_s23, 10 }
  0x30   : > { %s114_s26 = scalar_lea.sflag (!%p108_p3), [#allocation3], %s1017_s23  ;;  %s1021_s30 = scalar_lea.vmem (!%p108_p3), [#allocation2], %s746_s24 }
  0x34   : > { %880 = dma.done.wait (%p1476_p6), %s114_s26, 16384  }
  0x35   : > { %882 = vsyncadd (%p1476_p6), %s114_s26, 4294950912  ;;  %v138_v0 = vld [vmem:[%s1021_s30] sm:$0xff]  ;;  %v139_v1 = vld [vmem:[%s1021_s30 + $0x8] sm:$0xff]  ;;  %s757_s25 = sshll.u32 %s941_s10, 14  ;;  %s1031_s27 = scalar_lea.vmem [#allocation5], %s746_s24  ;;  %v906_v6 = vmov -1.0  }
  0x36   : > { %v140_v2 = vld [vmem:[%s1021_s30 + $0x10] sm:$0xff]  ;;  %s665_s17 = sshll.u32 %s1031_s27, 4  ;;  %vm266_vm0 = vcmp.ge.f32.partialorder %v138_v0, 0.0  ;;  %vm267_vm1 = vcmp.ge.f32.partialorder %v139_v1, 0.0  ;;  %v141_v3 = vld [vmem:[%s1021_s30 + $0x18] sm:$0xff]  ;;  %v142_v4 = vld [vmem:[%s1021_s30 + $0x20] sm:$0xff]  ;;  %s1411_s2 = scalar_lea.hbm %s1468_s1, %s757_s25  ;;  %s1415_s17 = int_to_ptr.vmem [resolvable:$true] %s665_s17 }
  0x37   : > { %vm268_vm2 = vcmp.ge.f32.partialorder %v140_v2, 0.0  ;;  %v143_v5 = vld [vmem:[%s1021_s30 + $0x28] sm:$0xff]  ;;  %v394_v7 = vsel %vm266_vm0, 1.0, %v906_v6  ;;  %v395_v8 = vsel %vm267_vm1, 1.0, %v906_v6  ;;  %vm269_vm3 = vcmp.ge.f32.partialorder %v141_v3, 0.0  ;;  %v144_v10 = vld [vmem:[%s1021_s30 + $0x30] sm:$0xff] }
  0x38   : > { %v396_v9 = vsel %vm268_vm2, 1.0, %v906_v6  ;;  %v145_v11 = vld [vmem:[%s1021_s30 + $0x38] sm:$0xff]  ;;  %522 = vst [vmem:[%s1031_s27] sm:$0xff] %v394_v7  ;;  %523 = vst [vmem:[%s1031_s27 + $0x8] sm:$0xff] %v395_v8  ;;  %v397_v12 = vsel %vm269_vm3, 1.0, %v906_v6  ;;  %vm270_vm4 = vcmp.ge.f32.partialorder %v142_v4, 0.0  ;;  %vm271_vm5 = vcmp.ge.f32.partialorder %v143_v5, 0.0 }
  0x39   : > { %524 = vst [vmem:[%s1031_s27 + $0x10] sm:$0xff] %v396_v9  ;;  %vm272_vm6 = vcmp.ge.f32.partialorder %v144_v10, 0.0  ;;  %v146_v13 = vld [vmem:[%s1021_s30 + $0x40] sm:$0xff]  ;;  %v147_v14 = vld [vmem:[%s1021_s30 + $0x48] sm:$0xff]  ;;  %525 = vst [vmem:[%s1031_s27 + $0x18] sm:$0xff] %v397_v12  ;;  %v398_v15 = vsel %vm270_vm4, 1.0, %v906_v6 }
  0x3a   : > { %v399_v16 = vsel %vm271_vm5, 1.0, %v906_v6  ;;  %v400_v17 = vsel %vm272_vm6, 1.0, %v906_v6  ;;  %vm273_vm7 = vcmp.ge.f32.partialorder %v145_v11, 0.0  ;;  %v148_v18 = vld [vmem:[%s1021_s30 + $0x50] sm:$0xff]  ;;  %v149_v19 = vld [vmem:[%s1021_s30 + $0x58] sm:$0xff]  ;;  %526 = vst [vmem:[%s1031_s27 + $0x20] sm:$0xff] %v398_v15 }
  0x3b   : > { %527 = vst [vmem:[%s1031_s27 + $0x28] sm:$0xff] %v399_v16  ;;  %528 = vst [vmem:[%s1031_s27 + $0x30] sm:$0xff] %v400_v17  ;;  %v401_v20 = vsel %vm273_vm7, 1.0, %v906_v6  ;;  %vm274_vm8 = vcmp.ge.f32.partialorder %v146_v13, 0.0  ;;  %vm275_vm9 = vcmp.ge.f32.partialorder %v147_v14, 0.0  ;;  %vm276_vm10 = vcmp.ge.f32.partialorder %v148_v18, 0.0 }
  0x3c   : > { %v150_v21 = vld [vmem:[%s1021_s30 + $0x60] sm:$0xff]  ;;  %v151_v22 = vld [vmem:[%s1021_s30 + $0x68] sm:$0xff]  ;;  %529 = vst [vmem:[%s1031_s27 + $0x38] sm:$0xff] %v401_v20  ;;  %v402_v23 = vsel %vm274_vm8, 1.0, %v906_v6  ;;  %v403_v24 = vsel %vm275_vm9, 1.0, %v906_v6  ;;  %v404_v25 = vsel %vm276_vm10, 1.0, %v906_v6 }
  0x3d   : > { %vm277_vm11 = vcmp.ge.f32.partialorder %v149_v19, 0.0  ;;  %v152_v26 = vld [vmem:[%s1021_s30 + $0x70] sm:$0xff]  ;;  %v153_v27 = vld [vmem:[%s1021_s30 + $0x78] sm:$0xff]  ;;  %530 = vst [vmem:[%s1031_s27 + $0x40] sm:$0xff] %v402_v23  ;;  %531 = vst [vmem:[%s1031_s27 + $0x48] sm:$0xff] %v403_v24  ;;  %vm278_vm12 = vcmp.ge.f32.partialorder %v150_v21, 0.0 }
  0x3e   : > { %532 = vst [vmem:[%s1031_s27 + $0x50] sm:$0xff] %v404_v25  ;;  %v405_v28 = vsel %vm277_vm11, 1.0, %v906_v6  ;;  %vm279_vm13 = vcmp.ge.f32.partialorder %v151_v22, 0.0  ;;  %vm280_vm14 = vcmp.ge.f32.partialorder %v152_v26, 0.0  ;;  %v154_v29 = vld [vmem:[%s1021_s30 + $0x80] sm:$0xff]  ;;  %v155_v30 = vld [vmem:[%s1021_s30 + $0x88] sm:$0xff] }
  0x3f   : > { %533 = vst [vmem:[%s1031_s27 + $0x58] sm:$0xff] %v405_v28  ;;  %v406_v31 = vsel %vm278_vm12, 1.0, %v906_v6  ;;  %v407_v32 = vsel %vm279_vm13, 1.0, %v906_v6  ;;  %v408_v33 = vsel %vm280_vm14, 1.0, %v906_v6  ;;  %vm281_vm15 = vcmp.ge.f32.partialorder %v153_v27, 0.0  ;;  %v156_v34 = vld [vmem:[%s1021_s30 + $0x90] sm:$0xff] }
  0x40   : > { %v157_v35 = vld [vmem:[%s1021_s30 + $0x98] sm:$0xff]  ;;  %534 = vst [vmem:[%s1031_s27 + $0x60] sm:$0xff] %v406_v31  ;;  %535 = vst [vmem:[%s1031_s27 + $0x68] sm:$0xff] %v407_v32  ;;  %v409_v36 = vsel %vm281_vm15, 1.0, %v906_v6  ;;  %vm282_vm0 = vcmp.ge.f32.partialorder %v154_v29, 0.0  ;;  %vm283_vm1 = vcmp.ge.f32.partialorder %v155_v30, 0.0 }
  0x41   : > { %536 = vst [vmem:[%s1031_s27 + $0x70] sm:$0xff] %v408_v33  ;;  %vm284_vm2 = vcmp.ge.f32.partialorder %v156_v34, 0.0  ;;  %v158_v37 = vld [vmem:[%s1021_s30 + $0xa0] sm:$0xff]  ;;  %v159_v38 = vld [vmem:[%s1021_s30 + $0xa8] sm:$0xff]  ;;  %537 = vst [vmem:[%s1031_s27 + $0x78] sm:$0xff] %v409_v36  ;;  %v410_v39 = vsel %vm282_vm0, 1.0, %v906_v6 }
  0x42   : > { %v411_v40 = vsel %vm283_vm1, 1.0, %v906_v6  ;;  %v412_v41 = vsel %vm284_vm2, 1.0, %v906_v6  ;;  %vm285_vm3 = vcmp.ge.f32.partialorder %v157_v35, 0.0  ;;  %v160_v42 = vld [vmem:[%s1021_s30 + $0xb0] sm:$0xff]  ;;  %v161_v43 = vld [vmem:[%s1021_s30 + $0xb8] sm:$0xff]  ;;  %538 = vst [vmem:[%s1031_s27 + $0x80] sm:$0xff] %v410_v39 }
  0x43   : > { %539 = vst [vmem:[%s1031_s27 + $0x88] sm:$0xff] %v411_v40  ;;  %540 = vst [vmem:[%s1031_s27 + $0x90] sm:$0xff] %v412_v41  ;;  %v413_v44 = vsel %vm285_vm3, 1.0, %v906_v6  ;;  %vm286_vm4 = vcmp.ge.f32.partialorder %v158_v37, 0.0  ;;  %vm287_vm5 = vcmp.ge.f32.partialorder %v159_v38, 0.0  ;;  %vm288_vm6 = vcmp.ge.f32.partialorder %v160_v42, 0.0 }
  0x44   : > { %v162_v45 = vld [vmem:[%s1021_s30 + $0xc0] sm:$0xff]  ;;  %v163_v46 = vld [vmem:[%s1021_s30 + $0xc8] sm:$0xff]  ;;  %541 = vst [vmem:[%s1031_s27 + $0x98] sm:$0xff] %v413_v44  ;;  %v414_v47 = vsel %vm286_vm4, 1.0, %v906_v6  ;;  %v415_v48 = vsel %vm287_vm5, 1.0, %v906_v6  ;;  %v416_v49 = vsel %vm288_vm6, 1.0, %v906_v6 }
  0x45   : > { %vm289_vm7 = vcmp.ge.f32.partialorder %v161_v43, 0.0  ;;  %v164_v50 = vld [vmem:[%s1021_s30 + $0xd0] sm:$0xff]  ;;  %v165_v51 = vld [vmem:[%s1021_s30 + $0xd8] sm:$0xff]  ;;  %542 = vst [vmem:[%s1031_s27 + $0xa0] sm:$0xff] %v414_v47  ;;  %543 = vst [vmem:[%s1031_s27 + $0xa8] sm:$0xff] %v415_v48  ;;  %vm290_vm8 = vcmp.ge.f32.partialorder %v162_v45, 0.0 }
  0x46   : > { %544 = vst [vmem:[%s1031_s27 + $0xb0] sm:$0xff] %v416_v49  ;;  %v417_v52 = vsel %vm289_vm7, 1.0, %v906_v6  ;;  %vm291_vm9 = vcmp.ge.f32.partialorder %v163_v46, 0.0  ;;  %vm292_vm10 = vcmp.ge.f32.partialorder %v164_v50, 0.0  ;;  %v166_v53 = vld [vmem:[%s1021_s30 + $0xe0] sm:$0xff]  ;;  %v167_v54 = vld [vmem:[%s1021_s30 + $0xe8] sm:$0xff] }
  0x47   : > { %545 = vst [vmem:[%s1031_s27 + $0xb8] sm:$0xff] %v417_v52  ;;  %v418_v55 = vsel %vm290_vm8, 1.0, %v906_v6  ;;  %v419_v56 = vsel %vm291_vm9, 1.0, %v906_v6  ;;  %v420_v57 = vsel %vm292_vm10, 1.0, %v906_v6  ;;  %vm293_vm11 = vcmp.ge.f32.partialorder %v165_v51, 0.0  ;;  %v168_v58 = vld [vmem:[%s1021_s30 + $0xf0] sm:$0xff] }
  0x48   : > { %v169_v59 = vld [vmem:[%s1021_s30 + $0xf8] sm:$0xff]  ;;  %546 = vst [vmem:[%s1031_s27 + $0xc0] sm:$0xff] %v418_v55  ;;  %547 = vst [vmem:[%s1031_s27 + $0xc8] sm:$0xff] %v419_v56  ;;  %v421_v60 = vsel %vm293_vm11, 1.0, %v906_v6  ;;  %vm294_vm12 = vcmp.ge.f32.partialorder %v166_v53, 0.0  ;;  %vm295_vm13 = vcmp.ge.f32.partialorder %v167_v54, 0.0 }
  0x49   : > { %548 = vst [vmem:[%s1031_s27 + $0xd0] sm:$0xff] %v420_v57  ;;  %vm296_vm14 = vcmp.ge.f32.partialorder %v168_v58, 0.0  ;;  %v170_v61 = vld [vmem:[%s1021_s30 + $0x100] sm:$0xff]  ;;  %v171_v62 = vld [vmem:[%s1021_s30 + $0x108] sm:$0xff]  ;;  %549 = vst [vmem:[%s1031_s27 + $0xd8] sm:$0xff] %v421_v60  ;;  %v422_v63 = vsel %vm294_vm12, 1.0, %v906_v6 }
  0x4a   : > { %v423_v0 = vsel %vm295_vm13, 1.0, %v906_v6  ;;  %v424_v1 = vsel %vm296_vm14, 1.0, %v906_v6  ;;  %vm297_vm15 = vcmp.ge.f32.partialorder %v169_v59, 0.0  ;;  %v172_v2 = vld [vmem:[%s1021_s30 + $0x110] sm:$0xff]  ;;  %v173_v3 = vld [vmem:[%s1021_s30 + $0x118] sm:$0xff]  ;;  %550 = vst [vmem:[%s1031_s27 + $0xe0] sm:$0xff] %v422_v63 }
  0x4b   : > { %551 = vst [vmem:[%s1031_s27 + $0xe8] sm:$0xff] %v423_v0  ;;  %552 = vst [vmem:[%s1031_s27 + $0xf0] sm:$0xff] %v424_v1  ;;  %v425_v4 = vsel %vm297_vm15, 1.0, %v906_v6  ;;  %vm298_vm0 = vcmp.ge.f32.partialorder %v170_v61, 0.0  ;;  %vm299_vm1 = vcmp.ge.f32.partialorder %v171_v62, 0.0  ;;  %vm300_vm2 = vcmp.ge.f32.partialorder %v172_v2, 0.0 }
  0x4c   : > { %v174_v5 = vld [vmem:[%s1021_s30 + $0x120] sm:$0xff]  ;;  %v175_v7 = vld [vmem:[%s1021_s30 + $0x128] sm:$0xff]  ;;  %553 = vst [vmem:[%s1031_s27 + $0xf8] sm:$0xff] %v425_v4  ;;  %v426_v8 = vsel %vm298_vm0, 1.0, %v906_v6  ;;  %v427_v9 = vsel %vm299_vm1, 1.0, %v906_v6  ;;  %v428_v10 = vsel %vm300_vm2, 1.0, %v906_v6 }
  0x4d   : > { %vm301_vm3 = vcmp.ge.f32.partialorder %v173_v3, 0.0  ;;  %v176_v11 = vld [vmem:[%s1021_s30 + $0x130] sm:$0xff]  ;;  %v177_v12 = vld [vmem:[%s1021_s30 + $0x138] sm:$0xff]  ;;  %554 = vst [vmem:[%s1031_s27 + $0x100] sm:$0xff] %v426_v8  ;;  %555 = vst [vmem:[%s1031_s27 + $0x108] sm:$0xff] %v427_v9  ;;  %vm302_vm4 = vcmp.ge.f32.partialorder %v174_v5, 0.0 }
  0x4e   : > { %556 = vst [vmem:[%s1031_s27 + $0x110] sm:$0xff] %v428_v10  ;;  %v429_v13 = vsel %vm301_vm3, 1.0, %v906_v6  ;;  %vm303_vm5 = vcmp.ge.f32.partialorder %v175_v7, 0.0  ;;  %vm304_vm6 = vcmp.ge.f32.partialorder %v176_v11, 0.0  ;;  %v178_v14 = vld [vmem:[%s1021_s30 + $0x140] sm:$0xff]  ;;  %v179_v15 = vld [vmem:[%s1021_s30 + $0x148] sm:$0xff] }
  0x4f   : > { %557 = vst [vmem:[%s1031_s27 + $0x118] sm:$0xff] %v429_v13  ;;  %v430_v16 = vsel %vm302_vm4, 1.0, %v906_v6  ;;  %v431_v17 = vsel %vm303_vm5, 1.0, %v906_v6  ;;  %v432_v18 = vsel %vm304_vm6, 1.0, %v906_v6  ;;  %vm305_vm7 = vcmp.ge.f32.partialorder %v177_v12, 0.0  ;;  %v180_v19 = vld [vmem:[%s1021_s30 + $0x150] sm:$0xff] }
  0x50   : > { %v181_v20 = vld [vmem:[%s1021_s30 + $0x158] sm:$0xff]  ;;  %558 = vst [vmem:[%s1031_s27 + $0x120] sm:$0xff] %v430_v16  ;;  %559 = vst [vmem:[%s1031_s27 + $0x128] sm:$0xff] %v431_v17  ;;  %v433_v21 = vsel %vm305_vm7, 1.0, %v906_v6  ;;  %vm306_vm8 = vcmp.ge.f32.partialorder %v178_v14, 0.0  ;;  %vm307_vm9 = vcmp.ge.f32.partialorder %v179_v15, 0.0 }
  0x51   : > { %560 = vst [vmem:[%s1031_s27 + $0x130] sm:$0xff] %v432_v18  ;;  %vm308_vm10 = vcmp.ge.f32.partialorder %v180_v19, 0.0  ;;  %v182_v22 = vld [vmem:[%s1021_s30 + $0x160] sm:$0xff]  ;;  %v183_v23 = vld [vmem:[%s1021_s30 + $0x168] sm:$0xff]  ;;  %561 = vst [vmem:[%s1031_s27 + $0x138] sm:$0xff] %v433_v21  ;;  %v434_v24 = vsel %vm306_vm8, 1.0, %v906_v6 }
  0x52   : > { %v435_v25 = vsel %vm307_vm9, 1.0, %v906_v6  ;;  %v436_v26 = vsel %vm308_vm10, 1.0, %v906_v6  ;;  %vm309_vm11 = vcmp.ge.f32.partialorder %v181_v20, 0.0  ;;  %v184_v27 = vld [vmem:[%s1021_s30 + $0x170] sm:$0xff]  ;;  %v185_v28 = vld [vmem:[%s1021_s30 + $0x178] sm:$0xff]  ;;  %562 = vst [vmem:[%s1031_s27 + $0x140] sm:$0xff] %v434_v24 }
  0x53   : > { %563 = vst [vmem:[%s1031_s27 + $0x148] sm:$0xff] %v435_v25  ;;  %564 = vst [vmem:[%s1031_s27 + $0x150] sm:$0xff] %v436_v26  ;;  %v437_v29 = vsel %vm309_vm11, 1.0, %v906_v6  ;;  %vm310_vm12 = vcmp.ge.f32.partialorder %v182_v22, 0.0  ;;  %vm311_vm13 = vcmp.ge.f32.partialorder %v183_v23, 0.0  ;;  %vm312_vm14 = vcmp.ge.f32.partialorder %v184_v27, 0.0 }
  0x54   : > { %v186_v30 = vld [vmem:[%s1021_s30 + $0x180] sm:$0xff]  ;;  %v187_v31 = vld [vmem:[%s1021_s30 + $0x188] sm:$0xff]  ;;  %565 = vst [vmem:[%s1031_s27 + $0x158] sm:$0xff] %v437_v29  ;;  %v438_v32 = vsel %vm310_vm12, 1.0, %v906_v6  ;;  %v439_v33 = vsel %vm311_vm13, 1.0, %v906_v6  ;;  %v440_v34 = vsel %vm312_vm14, 1.0, %v906_v6 }
  0x55   : > { %vm313_vm15 = vcmp.ge.f32.partialorder %v185_v28, 0.0  ;;  %v188_v35 = vld [vmem:[%s1021_s30 + $0x190] sm:$0xff]  ;;  %v189_v36 = vld [vmem:[%s1021_s30 + $0x198] sm:$0xff]  ;;  %566 = vst [vmem:[%s1031_s27 + $0x160] sm:$0xff] %v438_v32  ;;  %567 = vst [vmem:[%s1031_s27 + $0x168] sm:$0xff] %v439_v33  ;;  %vm314_vm0 = vcmp.ge.f32.partialorder %v186_v30, 0.0 }
  0x56   : > { %568 = vst [vmem:[%s1031_s27 + $0x170] sm:$0xff] %v440_v34  ;;  %v441_v37 = vsel %vm313_vm15, 1.0, %v906_v6  ;;  %vm315_vm1 = vcmp.ge.f32.partialorder %v187_v31, 0.0  ;;  %vm316_vm2 = vcmp.ge.f32.partialorder %v188_v35, 0.0  ;;  %v190_v38 = vld [vmem:[%s1021_s30 + $0x1a0] sm:$0xff]  ;;  %v191_v39 = vld [vmem:[%s1021_s30 + $0x1a8] sm:$0xff] }
  0x57   : > { %569 = vst [vmem:[%s1031_s27 + $0x178] sm:$0xff] %v441_v37  ;;  %v442_v40 = vsel %vm314_vm0, 1.0, %v906_v6  ;;  %v443_v41 = vsel %vm315_vm1, 1.0, %v906_v6  ;;  %v444_v42 = vsel %vm316_vm2, 1.0, %v906_v6  ;;  %vm317_vm3 = vcmp.ge.f32.partialorder %v189_v36, 0.0  ;;  %v192_v43 = vld [vmem:[%s1021_s30 + $0x1b0] sm:$0xff] }
  0x58   : > { %v193_v44 = vld [vmem:[%s1021_s30 + $0x1b8] sm:$0xff]  ;;  %570 = vst [vmem:[%s1031_s27 + $0x180] sm:$0xff] %v442_v40  ;;  %571 = vst [vmem:[%s1031_s27 + $0x188] sm:$0xff] %v443_v41  ;;  %v445_v45 = vsel %vm317_vm3, 1.0, %v906_v6  ;;  %vm318_vm4 = vcmp.ge.f32.partialorder %v190_v38, 0.0  ;;  %vm319_vm5 = vcmp.ge.f32.partialorder %v191_v39, 0.0 }
  0x59   : > { %572 = vst [vmem:[%s1031_s27 + $0x190] sm:$0xff] %v444_v42  ;;  %vm320_vm6 = vcmp.ge.f32.partialorder %v192_v43, 0.0  ;;  %v194_v46 = vld [vmem:[%s1021_s30 + $0x1c0] sm:$0xff]  ;;  %v195_v47 = vld [vmem:[%s1021_s30 + $0x1c8] sm:$0xff]  ;;  %573 = vst [vmem:[%s1031_s27 + $0x198] sm:$0xff] %v445_v45  ;;  %v446_v48 = vsel %vm318_vm4, 1.0, %v906_v6 }
  0x5a   : > { %v447_v49 = vsel %vm319_vm5, 1.0, %v906_v6  ;;  %v448_v50 = vsel %vm320_vm6, 1.0, %v906_v6  ;;  %vm321_vm7 = vcmp.ge.f32.partialorder %v193_v44, 0.0  ;;  %v196_v51 = vld [vmem:[%s1021_s30 + $0x1d0] sm:$0xff]  ;;  %v197_v52 = vld [vmem:[%s1021_s30 + $0x1d8] sm:$0xff]  ;;  %574 = vst [vmem:[%s1031_s27 + $0x1a0] sm:$0xff] %v446_v48 }
  0x5b   : > { %575 = vst [vmem:[%s1031_s27 + $0x1a8] sm:$0xff] %v447_v49  ;;  %576 = vst [vmem:[%s1031_s27 + $0x1b0] sm:$0xff] %v448_v50  ;;  %v449_v53 = vsel %vm321_vm7, 1.0, %v906_v6  ;;  %vm322_vm8 = vcmp.ge.f32.partialorder %v194_v46, 0.0  ;;  %vm323_vm9 = vcmp.ge.f32.partialorder %v195_v47, 0.0  ;;  %vm324_vm10 = vcmp.ge.f32.partialorder %v196_v51, 0.0 }
  0x5c   : > { %v198_v54 = vld [vmem:[%s1021_s30 + $0x1e0] sm:$0xff]  ;;  %v199_v55 = vld [vmem:[%s1021_s30 + $0x1e8] sm:$0xff]  ;;  %577 = vst [vmem:[%s1031_s27 + $0x1b8] sm:$0xff] %v449_v53  ;;  %v450_v56 = vsel %vm322_vm8, 1.0, %v906_v6  ;;  %v451_v57 = vsel %vm323_vm9, 1.0, %v906_v6  ;;  %v452_v58 = vsel %vm324_vm10, 1.0, %v906_v6 }
  0x5d   : > { %vm325_vm11 = vcmp.ge.f32.partialorder %v197_v52, 0.0  ;;  %v200_v59 = vld [vmem:[%s1021_s30 + $0x1f0] sm:$0xff]  ;;  %v201_v60 = vld [vmem:[%s1021_s30 + $0x1f8] sm:$0xff]  ;;  %578 = vst [vmem:[%s1031_s27 + $0x1c0] sm:$0xff] %v450_v56  ;;  %579 = vst [vmem:[%s1031_s27 + $0x1c8] sm:$0xff] %v451_v57  ;;  %vm326_vm12 = vcmp.ge.f32.partialorder %v198_v54, 0.0 }
  0x5e   : > { %580 = vst [vmem:[%s1031_s27 + $0x1d0] sm:$0xff] %v452_v58  ;;  %v453_v61 = vsel %vm325_vm11, 1.0, %v906_v6  ;;  %vm327_vm13 = vcmp.ge.f32.partialorder %v199_v55, 0.0  ;;  %vm328_vm14 = vcmp.ge.f32.partialorder %v200_v59, 0.0  ;;  %v202_v62 = vld [vmem:[%s1021_s30 + $0x200] sm:$0xff]  ;;  %v203_v63 = vld [vmem:[%s1021_s30 + $0x208] sm:$0xff] }
  0x5f   : > { %581 = vst [vmem:[%s1031_s27 + $0x1d8] sm:$0xff] %v453_v61  ;;  %v454_v0 = vsel %vm326_vm12, 1.0, %v906_v6  ;;  %v455_v1 = vsel %vm327_vm13, 1.0, %v906_v6  ;;  %v456_v2 = vsel %vm328_vm14, 1.0, %v906_v6  ;;  %vm329_vm15 = vcmp.ge.f32.partialorder %v201_v60, 0.0  ;;  %v204_v3 = vld [vmem:[%s1021_s30 + $0x210] sm:$0xff] }
  0x60   : > { %v205_v4 = vld [vmem:[%s1021_s30 + $0x218] sm:$0xff]  ;;  %582 = vst [vmem:[%s1031_s27 + $0x1e0] sm:$0xff] %v454_v0  ;;  %583 = vst [vmem:[%s1031_s27 + $0x1e8] sm:$0xff] %v455_v1  ;;  %v457_v5 = vsel %vm329_vm15, 1.0, %v906_v6  ;;  %vm330_vm0 = vcmp.ge.f32.partialorder %v202_v62, 0.0  ;;  %vm331_vm1 = vcmp.ge.f32.partialorder %v203_v63, 0.0 }
  0x61   : > { %584 = vst [vmem:[%s1031_s27 + $0x1f0] sm:$0xff] %v456_v2  ;;  %vm332_vm2 = vcmp.ge.f32.partialorder %v204_v3, 0.0  ;;  %v206_v7 = vld [vmem:[%s1021_s30 + $0x220] sm:$0xff]  ;;  %v207_v8 = vld [vmem:[%s1021_s30 + $0x228] sm:$0xff]  ;;  %585 = vst [vmem:[%s1031_s27 + $0x1f8] sm:$0xff] %v457_v5  ;;  %v458_v9 = vsel %vm330_vm0, 1.0, %v906_v6 }
  0x62   : > { %v459_v10 = vsel %vm331_vm1, 1.0, %v906_v6  ;;  %v460_v11 = vsel %vm332_vm2, 1.0, %v906_v6  ;;  %vm333_vm3 = vcmp.ge.f32.partialorder %v205_v4, 0.0  ;;  %v208_v12 = vld [vmem:[%s1021_s30 + $0x230] sm:$0xff]  ;;  %v209_v13 = vld [vmem:[%s1021_s30 + $0x238] sm:$0xff]  ;;  %586 = vst [vmem:[%s1031_s27 + $0x200] sm:$0xff] %v458_v9 }
  0x63   : > { %587 = vst [vmem:[%s1031_s27 + $0x208] sm:$0xff] %v459_v10  ;;  %588 = vst [vmem:[%s1031_s27 + $0x210] sm:$0xff] %v460_v11  ;;  %v461_v14 = vsel %vm333_vm3, 1.0, %v906_v6  ;;  %vm334_vm4 = vcmp.ge.f32.partialorder %v206_v7, 0.0  ;;  %vm335_vm5 = vcmp.ge.f32.partialorder %v207_v8, 0.0  ;;  %vm336_vm6 = vcmp.ge.f32.partialorder %v208_v12, 0.0 }
  0x64   : > { %v210_v15 = vld [vmem:[%s1021_s30 + $0x240] sm:$0xff]  ;;  %v211_v16 = vld [vmem:[%s1021_s30 + $0x248] sm:$0xff]  ;;  %589 = vst [vmem:[%s1031_s27 + $0x218] sm:$0xff] %v461_v14  ;;  %v462_v17 = vsel %vm334_vm4, 1.0, %v906_v6  ;;  %v463_v18 = vsel %vm335_vm5, 1.0, %v906_v6  ;;  %v464_v19 = vsel %vm336_vm6, 1.0, %v906_v6 }
  0x65   : > { %vm337_vm7 = vcmp.ge.f32.partialorder %v209_v13, 0.0  ;;  %v212_v20 = vld [vmem:[%s1021_s30 + $0x250] sm:$0xff]  ;;  %v213_v21 = vld [vmem:[%s1021_s30 + $0x258] sm:$0xff]  ;;  %590 = vst [vmem:[%s1031_s27 + $0x220] sm:$0xff] %v462_v17  ;;  %591 = vst [vmem:[%s1031_s27 + $0x228] sm:$0xff] %v463_v18  ;;  %vm338_vm8 = vcmp.ge.f32.partialorder %v210_v15, 0.0 }
  0x66   : > { %592 = vst [vmem:[%s1031_s27 + $0x230] sm:$0xff] %v464_v19  ;;  %v465_v22 = vsel %vm337_vm7, 1.0, %v906_v6  ;;  %vm339_vm9 = vcmp.ge.f32.partialorder %v211_v16, 0.0  ;;  %vm340_vm10 = vcmp.ge.f32.partialorder %v212_v20, 0.0  ;;  %v214_v23 = vld [vmem:[%s1021_s30 + $0x260] sm:$0xff]  ;;  %v215_v24 = vld [vmem:[%s1021_s30 + $0x268] sm:$0xff] }
  0x67   : > { %593 = vst [vmem:[%s1031_s27 + $0x238] sm:$0xff] %v465_v22  ;;  %v466_v25 = vsel %vm338_vm8, 1.0, %v906_v6  ;;  %v467_v26 = vsel %vm339_vm9, 1.0, %v906_v6  ;;  %v468_v27 = vsel %vm340_vm10, 1.0, %v906_v6  ;;  %vm341_vm11 = vcmp.ge.f32.partialorder %v213_v21, 0.0  ;;  %v216_v28 = vld [vmem:[%s1021_s30 + $0x270] sm:$0xff] }
  0x68   : > { %v217_v29 = vld [vmem:[%s1021_s30 + $0x278] sm:$0xff]  ;;  %594 = vst [vmem:[%s1031_s27 + $0x240] sm:$0xff] %v466_v25  ;;  %595 = vst [vmem:[%s1031_s27 + $0x248] sm:$0xff] %v467_v26  ;;  %v469_v30 = vsel %vm341_vm11, 1.0, %v906_v6  ;;  %vm342_vm12 = vcmp.ge.f32.partialorder %v214_v23, 0.0  ;;  %vm343_vm13 = vcmp.ge.f32.partialorder %v215_v24, 0.0 }
  0x69   : > { %596 = vst [vmem:[%s1031_s27 + $0x250] sm:$0xff] %v468_v27  ;;  %vm344_vm14 = vcmp.ge.f32.partialorder %v216_v28, 0.0  ;;  %v218_v31 = vld [vmem:[%s1021_s30 + $0x280] sm:$0xff]  ;;  %v219_v32 = vld [vmem:[%s1021_s30 + $0x288] sm:$0xff]  ;;  %597 = vst [vmem:[%s1031_s27 + $0x258] sm:$0xff] %v469_v30  ;;  %v470_v33 = vsel %vm342_vm12, 1.0, %v906_v6 }
  0x6a   : > { %v471_v34 = vsel %vm343_vm13, 1.0, %v906_v6  ;;  %v472_v35 = vsel %vm344_vm14, 1.0, %v906_v6  ;;  %vm345_vm15 = vcmp.ge.f32.partialorder %v217_v29, 0.0  ;;  %v220_v36 = vld [vmem:[%s1021_s30 + $0x290] sm:$0xff]  ;;  %v221_v37 = vld [vmem:[%s1021_s30 + $0x298] sm:$0xff]  ;;  %598 = vst [vmem:[%s1031_s27 + $0x260] sm:$0xff] %v470_v33 }
  0x6b   : > { %599 = vst [vmem:[%s1031_s27 + $0x268] sm:$0xff] %v471_v34  ;;  %600 = vst [vmem:[%s1031_s27 + $0x270] sm:$0xff] %v472_v35  ;;  %v473_v38 = vsel %vm345_vm15, 1.0, %v906_v6  ;;  %vm346_vm0 = vcmp.ge.f32.partialorder %v218_v31, 0.0  ;;  %vm347_vm1 = vcmp.ge.f32.partialorder %v219_v32, 0.0  ;;  %vm348_vm2 = vcmp.ge.f32.partialorder %v220_v36, 0.0 }
  0x6c   : > { %v222_v39 = vld [vmem:[%s1021_s30 + $0x2a0] sm:$0xff]  ;;  %v223_v40 = vld [vmem:[%s1021_s30 + $0x2a8] sm:$0xff]  ;;  %601 = vst [vmem:[%s1031_s27 + $0x278] sm:$0xff] %v473_v38  ;;  %v474_v41 = vsel %vm346_vm0, 1.0, %v906_v6  ;;  %v475_v42 = vsel %vm347_vm1, 1.0, %v906_v6  ;;  %v476_v43 = vsel %vm348_vm2, 1.0, %v906_v6 }
  0x6d   : > { %vm349_vm3 = vcmp.ge.f32.partialorder %v221_v37, 0.0  ;;  %v224_v44 = vld [vmem:[%s1021_s30 + $0x2b0] sm:$0xff]  ;;  %v225_v45 = vld [vmem:[%s1021_s30 + $0x2b8] sm:$0xff]  ;;  %602 = vst [vmem:[%s1031_s27 + $0x280] sm:$0xff] %v474_v41  ;;  %603 = vst [vmem:[%s1031_s27 + $0x288] sm:$0xff] %v475_v42  ;;  %vm350_vm4 = vcmp.ge.f32.partialorder %v222_v39, 0.0 }
  0x6e   : > { %604 = vst [vmem:[%s1031_s27 + $0x290] sm:$0xff] %v476_v43  ;;  %v477_v46 = vsel %vm349_vm3, 1.0, %v906_v6  ;;  %vm351_vm5 = vcmp.ge.f32.partialorder %v223_v40, 0.0  ;;  %vm352_vm6 = vcmp.ge.f32.partialorder %v224_v44, 0.0  ;;  %v226_v47 = vld [vmem:[%s1021_s30 + $0x2c0] sm:$0xff]  ;;  %v227_v48 = vld [vmem:[%s1021_s30 + $0x2c8] sm:$0xff] }
  0x6f   : > { %605 = vst [vmem:[%s1031_s27 + $0x298] sm:$0xff] %v477_v46  ;;  %v478_v49 = vsel %vm350_vm4, 1.0, %v906_v6  ;;  %v479_v50 = vsel %vm351_vm5, 1.0, %v906_v6  ;;  %v480_v51 = vsel %vm352_vm6, 1.0, %v906_v6  ;;  %vm353_vm7 = vcmp.ge.f32.partialorder %v225_v45, 0.0  ;;  %v228_v52 = vld [vmem:[%s1021_s30 + $0x2d0] sm:$0xff] }
  0x70   : > { %v229_v53 = vld [vmem:[%s1021_s30 + $0x2d8] sm:$0xff]  ;;  %606 = vst [vmem:[%s1031_s27 + $0x2a0] sm:$0xff] %v478_v49  ;;  %607 = vst [vmem:[%s1031_s27 + $0x2a8] sm:$0xff] %v479_v50  ;;  %v481_v54 = vsel %vm353_vm7, 1.0, %v906_v6  ;;  %vm354_vm8 = vcmp.ge.f32.partialorder %v226_v47, 0.0  ;;  %vm355_vm9 = vcmp.ge.f32.partialorder %v227_v48, 0.0 }
  0x71   : > { %608 = vst [vmem:[%s1031_s27 + $0x2b0] sm:$0xff] %v480_v51  ;;  %vm356_vm10 = vcmp.ge.f32.partialorder %v228_v52, 0.0  ;;  %v230_v55 = vld [vmem:[%s1021_s30 + $0x2e0] sm:$0xff]  ;;  %v231_v56 = vld [vmem:[%s1021_s30 + $0x2e8] sm:$0xff]  ;;  %609 = vst [vmem:[%s1031_s27 + $0x2b8] sm:$0xff] %v481_v54  ;;  %v482_v57 = vsel %vm354_vm8, 1.0, %v906_v6 }
  0x72   : > { %v483_v58 = vsel %vm355_vm9, 1.0, %v906_v6  ;;  %v484_v59 = vsel %vm356_vm10, 1.0, %v906_v6  ;;  %vm357_vm11 = vcmp.ge.f32.partialorder %v229_v53, 0.0  ;;  %v232_v60 = vld [vmem:[%s1021_s30 + $0x2f0] sm:$0xff]  ;;  %v233_v61 = vld [vmem:[%s1021_s30 + $0x2f8] sm:$0xff]  ;;  %610 = vst [vmem:[%s1031_s27 + $0x2c0] sm:$0xff] %v482_v57 }
  0x73   : > { %611 = vst [vmem:[%s1031_s27 + $0x2c8] sm:$0xff] %v483_v58  ;;  %612 = vst [vmem:[%s1031_s27 + $0x2d0] sm:$0xff] %v484_v59  ;;  %v485_v62 = vsel %vm357_vm11, 1.0, %v906_v6  ;;  %vm358_vm12 = vcmp.ge.f32.partialorder %v230_v55, 0.0  ;;  %vm359_vm13 = vcmp.ge.f32.partialorder %v231_v56, 0.0  ;;  %vm360_vm14 = vcmp.ge.f32.partialorder %v232_v60, 0.0 }
  0x74   : > { %v234_v63 = vld [vmem:[%s1021_s30 + $0x300] sm:$0xff]  ;;  %v235_v0 = vld [vmem:[%s1021_s30 + $0x308] sm:$0xff]  ;;  %613 = vst [vmem:[%s1031_s27 + $0x2d8] sm:$0xff] %v485_v62  ;;  %v486_v1 = vsel %vm358_vm12, 1.0, %v906_v6  ;;  %v487_v2 = vsel %vm359_vm13, 1.0, %v906_v6  ;;  %v488_v3 = vsel %vm360_vm14, 1.0, %v906_v6 }
  0x75   : > { %vm361_vm15 = vcmp.ge.f32.partialorder %v233_v61, 0.0  ;;  %v236_v4 = vld [vmem:[%s1021_s30 + $0x310] sm:$0xff]  ;;  %v237_v5 = vld [vmem:[%s1021_s30 + $0x318] sm:$0xff]  ;;  %614 = vst [vmem:[%s1031_s27 + $0x2e0] sm:$0xff] %v486_v1  ;;  %615 = vst [vmem:[%s1031_s27 + $0x2e8] sm:$0xff] %v487_v2  ;;  %vm362_vm0 = vcmp.ge.f32.partialorder %v234_v63, 0.0 }
  0x76   : > { %616 = vst [vmem:[%s1031_s27 + $0x2f0] sm:$0xff] %v488_v3  ;;  %v489_v7 = vsel %vm361_vm15, 1.0, %v906_v6  ;;  %vm363_vm1 = vcmp.ge.f32.partialorder %v235_v0, 0.0  ;;  %vm364_vm2 = vcmp.ge.f32.partialorder %v236_v4, 0.0  ;;  %v238_v8 = vld [vmem:[%s1021_s30 + $0x320] sm:$0xff]  ;;  %v239_v9 = vld [vmem:[%s1021_s30 + $0x328] sm:$0xff] }
  0x77   : > { %617 = vst [vmem:[%s1031_s27 + $0x2f8] sm:$0xff] %v489_v7  ;;  %v490_v10 = vsel %vm362_vm0, 1.0, %v906_v6  ;;  %v491_v11 = vsel %vm363_vm1, 1.0, %v906_v6  ;;  %v492_v12 = vsel %vm364_vm2, 1.0, %v906_v6  ;;  %vm365_vm3 = vcmp.ge.f32.partialorder %v237_v5, 0.0  ;;  %v240_v13 = vld [vmem:[%s1021_s30 + $0x330] sm:$0xff] }
  0x78   : > { %v241_v14 = vld [vmem:[%s1021_s30 + $0x338] sm:$0xff]  ;;  %618 = vst [vmem:[%s1031_s27 + $0x300] sm:$0xff] %v490_v10  ;;  %619 = vst [vmem:[%s1031_s27 + $0x308] sm:$0xff] %v491_v11  ;;  %v493_v15 = vsel %vm365_vm3, 1.0, %v906_v6  ;;  %vm366_vm4 = vcmp.ge.f32.partialorder %v238_v8, 0.0  ;;  %vm367_vm5 = vcmp.ge.f32.partialorder %v239_v9, 0.0 }
  0x79   : > { %620 = vst [vmem:[%s1031_s27 + $0x310] sm:$0xff] %v492_v12  ;;  %vm368_vm6 = vcmp.ge.f32.partialorder %v240_v13, 0.0  ;;  %v242_v16 = vld [vmem:[%s1021_s30 + $0x340] sm:$0xff]  ;;  %v243_v17 = vld [vmem:[%s1021_s30 + $0x348] sm:$0xff]  ;;  %621 = vst [vmem:[%s1031_s27 + $0x318] sm:$0xff] %v493_v15  ;;  %v494_v18 = vsel %vm366_vm4, 1.0, %v906_v6 }
  0x7a   : > { %v495_v19 = vsel %vm367_vm5, 1.0, %v906_v6  ;;  %v496_v20 = vsel %vm368_vm6, 1.0, %v906_v6  ;;  %vm369_vm7 = vcmp.ge.f32.partialorder %v241_v14, 0.0  ;;  %v244_v21 = vld [vmem:[%s1021_s30 + $0x350] sm:$0xff]  ;;  %v245_v22 = vld [vmem:[%s1021_s30 + $0x358] sm:$0xff]  ;;  %622 = vst [vmem:[%s1031_s27 + $0x320] sm:$0xff] %v494_v18 }
  0x7b   : > { %623 = vst [vmem:[%s1031_s27 + $0x328] sm:$0xff] %v495_v19  ;;  %624 = vst [vmem:[%s1031_s27 + $0x330] sm:$0xff] %v496_v20  ;;  %v497_v23 = vsel %vm369_vm7, 1.0, %v906_v6  ;;  %vm370_vm8 = vcmp.ge.f32.partialorder %v242_v16, 0.0  ;;  %vm371_vm9 = vcmp.ge.f32.partialorder %v243_v17, 0.0  ;;  %vm372_vm10 = vcmp.ge.f32.partialorder %v244_v21, 0.0 }
  0x7c   : > { %v246_v24 = vld [vmem:[%s1021_s30 + $0x360] sm:$0xff]  ;;  %v247_v25 = vld [vmem:[%s1021_s30 + $0x368] sm:$0xff]  ;;  %625 = vst [vmem:[%s1031_s27 + $0x338] sm:$0xff] %v497_v23  ;;  %v498_v26 = vsel %vm370_vm8, 1.0, %v906_v6  ;;  %v499_v27 = vsel %vm371_vm9, 1.0, %v906_v6  ;;  %v500_v28 = vsel %vm372_vm10, 1.0, %v906_v6 }
  0x7d   : > { %vm373_vm11 = vcmp.ge.f32.partialorder %v245_v22, 0.0  ;;  %v248_v29 = vld [vmem:[%s1021_s30 + $0x370] sm:$0xff]  ;;  %v249_v30 = vld [vmem:[%s1021_s30 + $0x378] sm:$0xff]  ;;  %626 = vst [vmem:[%s1031_s27 + $0x340] sm:$0xff] %v498_v26  ;;  %627 = vst [vmem:[%s1031_s27 + $0x348] sm:$0xff] %v499_v27  ;;  %vm374_vm12 = vcmp.ge.f32.partialorder %v246_v24, 0.0 }
  0x7e   : > { %628 = vst [vmem:[%s1031_s27 + $0x350] sm:$0xff] %v500_v28  ;;  %v501_v31 = vsel %vm373_vm11, 1.0, %v906_v6  ;;  %vm375_vm13 = vcmp.ge.f32.partialorder %v247_v25, 0.0  ;;  %vm376_vm14 = vcmp.ge.f32.partialorder %v248_v29, 0.0  ;;  %v250_v32 = vld [vmem:[%s1021_s30 + $0x380] sm:$0xff]  ;;  %v251_v33 = vld [vmem:[%s1021_s30 + $0x388] sm:$0xff] }
  0x7f   : > { %629 = vst [vmem:[%s1031_s27 + $0x358] sm:$0xff] %v501_v31  ;;  %v502_v34 = vsel %vm374_vm12, 1.0, %v906_v6  ;;  %v503_v35 = vsel %vm375_vm13, 1.0, %v906_v6  ;;  %v504_v36 = vsel %vm376_vm14, 1.0, %v906_v6  ;;  %vm377_vm15 = vcmp.ge.f32.partialorder %v249_v30, 0.0  ;;  %v252_v37 = vld [vmem:[%s1021_s30 + $0x390] sm:$0xff] }
  0x80   : > { %v253_v38 = vld [vmem:[%s1021_s30 + $0x398] sm:$0xff]  ;;  %630 = vst [vmem:[%s1031_s27 + $0x360] sm:$0xff] %v502_v34  ;;  %631 = vst [vmem:[%s1031_s27 + $0x368] sm:$0xff] %v503_v35  ;;  %v505_v39 = vsel %vm377_vm15, 1.0, %v906_v6  ;;  %vm378_vm0 = vcmp.ge.f32.partialorder %v250_v32, 0.0  ;;  %vm379_vm1 = vcmp.ge.f32.partialorder %v251_v33, 0.0 }
  0x81   : > { %632 = vst [vmem:[%s1031_s27 + $0x370] sm:$0xff] %v504_v36  ;;  %vm380_vm2 = vcmp.ge.f32.partialorder %v252_v37, 0.0  ;;  %v254_v40 = vld [vmem:[%s1021_s30 + $0x3a0] sm:$0xff]  ;;  %v255_v41 = vld [vmem:[%s1021_s30 + $0x3a8] sm:$0xff]  ;;  %633 = vst [vmem:[%s1031_s27 + $0x378] sm:$0xff] %v505_v39  ;;  %v506_v42 = vsel %vm378_vm0, 1.0, %v906_v6 }
  0x82   : > { %v507_v43 = vsel %vm379_vm1, 1.0, %v906_v6  ;;  %v508_v44 = vsel %vm380_vm2, 1.0, %v906_v6  ;;  %vm381_vm3 = vcmp.ge.f32.partialorder %v253_v38, 0.0  ;;  %v256_v45 = vld [vmem:[%s1021_s30 + $0x3b0] sm:$0xff]  ;;  %v257_v46 = vld [vmem:[%s1021_s30 + $0x3b8] sm:$0xff]  ;;  %634 = vst [vmem:[%s1031_s27 + $0x380] sm:$0xff] %v506_v42 }
  0x83   : > { %635 = vst [vmem:[%s1031_s27 + $0x388] sm:$0xff] %v507_v43  ;;  %636 = vst [vmem:[%s1031_s27 + $0x390] sm:$0xff] %v508_v44  ;;  %v509_v47 = vsel %vm381_vm3, 1.0, %v906_v6  ;;  %vm382_vm4 = vcmp.ge.f32.partialorder %v254_v40, 0.0  ;;  %vm383_vm5 = vcmp.ge.f32.partialorder %v255_v41, 0.0  ;;  %vm384_vm6 = vcmp.ge.f32.partialorder %v256_v45, 0.0 }
  0x84   : > { %v258_v48 = vld [vmem:[%s1021_s30 + $0x3c0] sm:$0xff]  ;;  %v259_v49 = vld [vmem:[%s1021_s30 + $0x3c8] sm:$0xff]  ;;  %637 = vst [vmem:[%s1031_s27 + $0x398] sm:$0xff] %v509_v47  ;;  %v510_v50 = vsel %vm382_vm4, 1.0, %v906_v6  ;;  %v511_v51 = vsel %vm383_vm5, 1.0, %v906_v6  ;;  %v512_v52 = vsel %vm384_vm6, 1.0, %v906_v6 }
  0x85   : > { %vm385_vm7 = vcmp.ge.f32.partialorder %v257_v46, 0.0  ;;  %v260_v53 = vld [vmem:[%s1021_s30 + $0x3d0] sm:$0xff]  ;;  %v261_v54 = vld [vmem:[%s1021_s30 + $0x3d8] sm:$0xff]  ;;  %638 = vst [vmem:[%s1031_s27 + $0x3a0] sm:$0xff] %v510_v50  ;;  %639 = vst [vmem:[%s1031_s27 + $0x3a8] sm:$0xff] %v511_v51  ;;  %vm386_vm8 = vcmp.ge.f32.partialorder %v258_v48, 0.0 }
  0x86   : > { %640 = vst [vmem:[%s1031_s27 + $0x3b0] sm:$0xff] %v512_v52  ;;  %v513_v55 = vsel %vm385_vm7, 1.0, %v906_v6  ;;  %vm387_vm9 = vcmp.ge.f32.partialorder %v259_v49, 0.0  ;;  %vm388_vm10 = vcmp.ge.f32.partialorder %v260_v53, 0.0  ;;  %v262_v56 = vld [vmem:[%s1021_s30 + $0x3e0] sm:$0xff]  ;;  %v263_v57 = vld [vmem:[%s1021_s30 + $0x3e8] sm:$0xff] }
  0x87   : > { %641 = vst [vmem:[%s1031_s27 + $0x3b8] sm:$0xff] %v513_v55  ;;  %v514_v58 = vsel %vm386_vm8, 1.0, %v906_v6  ;;  %v515_v59 = vsel %vm387_vm9, 1.0, %v906_v6  ;;  %v516_v60 = vsel %vm388_vm10, 1.0, %v906_v6  ;;  %vm389_vm11 = vcmp.ge.f32.partialorder %v261_v54, 0.0  ;;  %v264_v61 = vld [vmem:[%s1021_s30 + $0x3f0] sm:$0xff] }
  0x88   : > { %v265_v62 = vld [vmem:[%s1021_s30 + $0x3f8] sm:$0xff]  ;;  %642 = vst [vmem:[%s1031_s27 + $0x3c0] sm:$0xff] %v514_v58  ;;  %643 = vst [vmem:[%s1031_s27 + $0x3c8] sm:$0xff] %v515_v59  ;;  %v517_v63 = vsel %vm389_vm11, 1.0, %v906_v6  ;;  %vm390_vm12 = vcmp.ge.f32.partialorder %v262_v56, 0.0  ;;  %vm391_vm13 = vcmp.ge.f32.partialorder %v263_v57, 0.0 }
  0x89   : > { %644 = vst [vmem:[%s1031_s27 + $0x3d0] sm:$0xff] %v516_v60  ;;  %vm392_vm14 = vcmp.ge.f32.partialorder %v264_v61, 0.0  ;;  %645 = vst [vmem:[%s1031_s27 + $0x3d8] sm:$0xff] %v517_v63  ;;  %v518_v0 = vsel %vm390_vm12, 1.0, %v906_v6  ;;  %v519_v1 = vsel %vm391_vm13, 1.0, %v906_v6  ;;  %vm393_vm15 = vcmp.ge.f32.partialorder %v265_v62, 0.0 }
  0x8a   : > { %v520_v2 = vsel %vm392_vm14, 1.0, %v906_v6  ;;  %646 = vst [vmem:[%s1031_s27 + $0x3e0] sm:$0xff] %v518_v0  ;;  %647 = vst [vmem:[%s1031_s27 + $0x3e8] sm:$0xff] %v519_v1  ;;  %v521_v3 = vsel %vm393_vm15, 1.0, %v906_v6  ;;  %s651_s10 = scalar_lea.sflag [#allocation4], %s1017_s23  ;;  %s837_s3 = scalar_lea.vmem %s1415_s17, 16384 }
  0x8b   : > { %648 = vst [vmem:[%s1031_s27 + $0x3f0] sm:$0xff] %v520_v2  ;;  %649 = vst [vmem:[%s1031_s27 + $0x3f8] sm:$0xff] %v521_v3  ;;  %p838_p11 = scmp.ne.s32.totalorder %s1415_s17, %s837_s3  ;;  %p1477_p12 = scmp.ne.s32.totalorder %s1473_s18, 0 }
  0x8c   : > { %s907_s4 = smov [#allocation5]  }
  0x8d   : > { %p839_p13 = pnand %p838_p11, %p1477_p12  ;;  %s841_s5 = sshll.u32 %s907_s4, 4  ;;  %s842_s5 = int_to_ptr.vmem [resolvable:$false] %s841_s5 }
  0x8e   : > { %s843_s11 = scalar_lea.vmem %s842_s5, 32768  ;;  %p844_p5 = scmp.lt.s32.totalorder %s1415_s17, %s842_s5 }
  0x8f   : > { %p840_p4 = pneg %p839_p13  ;;  %p845_p7 = scmp.lt.s32.totalorder %s843_s11, %s837_s3 }
  0x91   : > { %p846_p8 = por %p845_p7, %p844_p5 }
  0x93   : > { %p847_p10 = pnand %p846_p8, %p840_p4 }
  0x95   : > { %850 = shalt.err (!%p847_p10)
}
  0x96   : > { %s851_s13 = scalar_lea.hbm %s1411_s2, 16384  ;;  %s855_s20 = scalar_lea.hbm %s1468_s1, 32768 }
  0x97   : > { %p852_p0 = scmp.ne.s32.totalorder %s1411_s2, %s851_s13  ;;  %p856_p1 = scmp.lt.s32.totalorder %s1411_s2, %s1468_s1 }
  0x98   : > { %p857_p3 = scmp.lt.s32.totalorder %s855_s20, %s851_s13 }
  0x99   : > { %p853_p2 = pnand %p852_p0, %p1477_p12 }
  0x9a   : > { %p858_p6 = por %p857_p3, %p856_p1 }
  0x9b   : > { %p854_p9 = pneg %p853_p2 }
  0x9d   : > { %p859_p11 = pnand %p858_p6, %p854_p9 }
  0x9f   : > { %862 = shalt.err (!%p859_p11)
}
  0xa0   : > { %s908_s24 = smov 1024   ;;  %s909_s26 = smov 64  }
  0xa1   : > { %760 = dma.vmem_to_hbm [thread:$0]  (%p1477_p12), %s1415_s17, 16384, %s1411_s2, %s651_s10, %s908_s24, %s908_s24, %s909_s26  }
  0xa2 PF: > { %s680_s30 = sand.u32 1, %s889_s6   ;;  %p1478_p13 = scmp.ne.s32.totalorder %s1474_s19, 0 }
  0xa3   : > { %p1479_p4 = scmp.ge.s32.totalorder %s901_s9, 2  ;;  %s681_s25 = scalar_lea.sflag [#allocation4], %s680_s30 }
  0xa5   : > { %p767_p5 = pnand %p1479_p4, %p1478_p13 }
  0xa7   : > { %p768_p7 = pneg %p767_p5 }
  0xa9   : > { %884 = dma.done.wait (%p768_p7), %s681_s25, 16384  }
  0xaa   : > { %886 = vsyncadd (%p768_p7), %s681_s25, 4294950912  ;;  %p14_p8 = scmp.ge.s32.totalorder %s945_s12, 4   ;;  %s1480_s6 = smov %s893_s7 }
  0xab   : > { %s1481_s7 = smov %s897_s8  ;;  %s1482_s8 = smov %s957_s15 }
  0xac   : > { %s1483_s9 = smov %s945_s12  ;;  %16 = sbr.rel (!%p14_p8) target bundleno = 5 (0x5), region = 69 }
  0xb1   :  { %686 = vsyncpa [#allocation3], 1 }
  0xb2   :  { %688 = vsyncpa [#allocation3 + $0x1], 1 }
  0xb3   :  { %689 = vsyncpa [#allocation4], 1 }
  0xb4   :  { %691 = vsyncpa [#allocation4 + $0x1], 1 }

</bundles_post_ra>
